<compile_context>
chip_gen: v7x
topology: tpu7x:2x2x1
jax: 0.10.0
libtpu: 0.0.40
codegen_flags: <defaults>
</compile_context>

<pallas_src>
import functools

import jax
import jax.numpy as jnp
from jax.experimental import pallas as pl
from jax.experimental.pallas import tpu as pltpu

# ----------------------------- config ---------------------------------------
B = 2           # batch
S = 8           # sequence length
HIDDEN = 32     # hidden_size
NH = 4          # num_attention_heads
NKV = 2         # num_key_value_heads
D = 16          # head_dim
N_REP = NH // NKV
QUERY_PRE_ATTN_SCALAR = 256.0
SCALING = QUERY_PRE_ATTN_SCALAR ** -0.5      # = 2^-4 (exact power of two)
RMS_EPS = 1e-6
ATTN_LOGIT_SOFTCAP = None                    # Gemma3 text config default
NEG_INF = -1e9


# --------------------- fused Gemma3 attention kernel -------------------------
def _gemma3_attn_kernel(x_ref, wqkv_ref, wo_ref, qnw_ref, knw_ref,
                        cos_ref, sin_ref, mask_ref, o_ref, w_ref, *,
                        batch, seq, n_heads, n_kv, head_dim,
                        scaling, eps, softcap):
    bf16 = jnp.bfloat16
    f32 = jnp.float32
    bs = batch * seq
    n_rep = n_heads // n_kv
    d2 = head_dim // 2
    n_groups = n_heads * batch

    x = x_ref[...].astype(bf16)                              # (B*S, HIDDEN)

    # One fused, exactly-128-lane QKV projection (bf16 operands, f32 acc).
    qkv = jnp.dot(x, wqkv_ref[...].astype(bf16),
                  preferred_element_type=f32)                # (B*S, NH*D+2*NKV*D)

    # cos/sin per (b, s) row; tile along sublanes for the (h, b, s) stacking.
    cos_bs = cos_ref[...].astype(f32)                        # (B*S, D)
    sin_bs = sin_ref[...].astype(f32)
    cos_q = jnp.concatenate([cos_bs] * n_heads, axis=0)      # (NH*B*S, D)
    sin_q = jnp.concatenate([sin_bs] * n_heads, axis=0)
    cos_k = cos_q[: n_kv * bs]                               # (NKV*B*S, D)
    sin_k = sin_q[: n_kv * bs]

    k_off = n_heads * head_dim
    v_off = k_off + n_kv * head_dim

    # Stack heads along sublanes, row order (h, b, s).
    q_st = jnp.concatenate(
        [qkv[:, h * head_dim:(h + 1) * head_dim] for h in range(n_heads)],
        axis=0)                                              # (NH*B*S, D)
    k_kv = jnp.concatenate(
        [qkv[:, k_off + j * head_dim:k_off + (j + 1) * head_dim]
         for j in range(n_kv)], axis=0)                      # (NKV*B*S, D)
    v_st = jnp.concatenate(
        [qkv[:, v_off + (h // n_rep) * head_dim:
                 v_off + (h // n_rep + 1) * head_dim]
         for h in range(n_heads)], axis=0)                   # (NH*B*S, D) (GQA repeat)

    # SCALING folded into the q RMSNorm weight (exact: norm mul + RoPE linear).
    qw = (1.0 + qnw_ref[...].astype(f32)) * scaling          # (1, D) broadcast
    kw = 1.0 + knw_ref[...].astype(f32)

    def rmsnorm(t, w_row):
        var = jnp.mean(t * t, axis=-1, keepdims=True)
        return t * jax.lax.rsqrt(var + eps) * w_row

    def rope(t, c, s):
        # rotate_half: concat(-x2, x1); runs only twice total (stacked q, k).
        rot = jnp.concatenate([-t[:, d2:], t[:, :d2]], axis=-1)
        return t * c + rot * s

    q_n = rope(rmsnorm(q_st, qw), cos_q, sin_q)              # (NH*B*S, D)
    k_n = rope(rmsnorm(k_kv, kw), cos_k, sin_k)              # (NKV*B*S, D)

    # GQA repeat of the already-normalized K via aligned sublane slices.
    k_rep = jnp.concatenate(
        [k_n[(h // n_rep) * bs:(h // n_rep + 1) * bs, :] for h in range(n_heads)],
        axis=0)                                              # (NH*B*S, D)

    # One stacked score matmul: q_n @ k_rep^T (contract over D, no transpose).
    scores = jax.lax.dot_general(
        q_n.astype(bf16), k_rep.astype(bf16),
        dimension_numbers=(((1,), (1,)), ((), ())),
        preferred_element_type=f32)                          # (NH*B*S, NH*B*S)
    if softcap is not None:
        scores = jnp.tanh(scores / softcap) * softcap
    scores = scores + mask_ref[...].astype(f32)              # block-diag + causal mask

    # Single softmax over the stacked block; cross-block entries underflow to 0.
    m = jnp.max(scores, axis=-1, keepdims=True)
    e = jnp.exp(scores - m)
    denom = jnp.sum(e, axis=-1, keepdims=True)
    probs = e * pl.reciprocal(denom, approx=False)           # one (64,1) reciprocal

    # Pack the per-(h,b) diagonal (S,S) prob blocks into ONE store.
    w_ref[...] = jnp.concatenate(
        [probs[g * seq:(g + 1) * seq, g * seq:(g + 1) * seq]
         for g in range(n_groups)], axis=0).astype(w_ref.dtype)   # (NH*B*S, S)

    # One stacked PV matmul.
    attn = jnp.dot(probs.astype(bf16), v_st.astype(bf16),
                   preferred_element_type=f32)               # (NH*B*S, D)

    # Regroup (h,b,s)-rows -> (b,s)-rows x (h,d)-lanes
    # == torch attn_output.transpose(1,2).reshape(B,S,NH*D).
    attn_bs = jnp.concatenate(
        [attn[h * bs:(h + 1) * bs, :] for h in range(n_heads)], axis=1)  # (B*S, NH*D)

    out = jnp.dot(attn_bs.astype(bf16), wo_ref[...].astype(bf16),
                  preferred_element_type=f32)                # (B*S, HIDDEN)
    o_ref[...] = out.astype(o_ref.dtype)


def gemma3_attention_forward(params, hidden_states, cos, sin, attention_mask):
    Bq, s, hm = hidden_states.shape
    bs = Bq * s
    n_groups = NH * Bq
    qkv_dim = NH * D + 2 * NKV * D

    # Layout plumbing (all free / tiny XLA ops outside the kernel).
    x2 = hidden_states.reshape(bs, hm)
    cos2 = cos.reshape(bs, D)
    sin2 = sin.reshape(bs, D)
    wqkv = jnp.concatenate([params["wq"], params["wk"], params["wv"]], axis=1)

    # Precomputed block-diagonal mask over (head, batch) groups (h-major):
    # in-block = the module's additive causal mask, cross-block = -1e9.
    b_of_g = jnp.tile(jnp.arange(Bq), NH)                    # group g = h*B + b -> b
    per_group = attention_mask[b_of_g, 0]                    # (G, s, s)
    same = jnp.eye(n_groups, dtype=bool)[:, None, :, None]   # (G,1,G,1)
    big_mask = jnp.where(same, per_group[:, :, None, :],
                         jnp.float32(NEG_INF)).reshape(n_groups * s, n_groups * s)

    kernel = functools.partial(
        _gemma3_attn_kernel,
        batch=Bq, seq=s, n_heads=NH, n_kv=NKV, head_dim=D,
        scaling=SCALING, eps=RMS_EPS, softcap=ATTN_LOGIT_SOFTCAP)

    out2, w_packed = pl.pallas_call(
        kernel,
        out_shape=(
            jax.ShapeDtypeStruct((bs, hm), hidden_states.dtype),
            jax.ShapeDtypeStruct((n_groups * s, s), jnp.float32),
        ),
        grid=(1,),                                            # single invocation
        in_specs=[
            pl.BlockSpec((bs, hm), lambda i: (0, 0)),             # x (B*S, HIDDEN)
            pl.BlockSpec((hm, qkv_dim), lambda i: (0, 0)),        # fused wqkv
            pl.BlockSpec((NH * D, hm), lambda i: (0, 0)),         # wo
            pl.BlockSpec((1, D), lambda i: (0, 0)),               # q_norm weight
            pl.BlockSpec((1, D), lambda i: (0, 0)),               # k_norm weight
            pl.BlockSpec((bs, D), lambda i: (0, 0)),              # cos (B*S, D)
            pl.BlockSpec((bs, D), lambda i: (0, 0)),              # sin (B*S, D)
            pl.BlockSpec((n_groups * s, n_groups * s), lambda i: (0, 0)),  # block-diag mask
        ],
        out_specs=(
            pl.BlockSpec((bs, hm), lambda i: (0, 0)),             # output slab
            pl.BlockSpec((n_groups * s, s), lambda i: (0, 0)),    # packed attn weights
        ),
        compiler_params=pltpu.CompilerParams(
            dimension_semantics=("arbitrary",)),                  # single serial step
    )(x2, wqkv, params["wo"], params["q_norm_w"], params["k_norm_w"],
      cos2, sin2, big_mask)

    out = out2.reshape(Bq, s, hm)
    attn_w = w_packed.reshape(NH, Bq, s, s).transpose(1, 0, 2, 3)  # (B, NH, S, S)
    return out, attn_w


# ------------------------------ pure-JAX reference ---------------------------
# Module-faithful ordering (norm -> rope -> scores*scaling -> mask -> softmax),
# mirroring only the MXU precision policy (bf16 operands, f32 accumulate) so
# the comparison isolates structural correctness.
def reference(params, x, cos, sin, mask):
    bf16 = jnp.bfloat16

    def mm(a, b):
        return jnp.dot(a.astype(bf16), b.astype(bf16),
                       preferred_element_type=jnp.float32)

    Bq, s, hm = x.shape
    x2 = x.reshape(Bq * s, hm)
    q = mm(x2, params["wq"]).reshape(Bq, s, NH, D).transpose(0, 2, 1, 3)
    k = mm(x2, params["wk"]).reshape(Bq, s, NKV, D).transpose(0, 2, 1, 3)
    v = mm(x2, params["wv"]).reshape(Bq, s, NKV, D).transpose(0, 2, 1, 3)

    def rms(t, w):
        var = jnp.mean(t * t, axis=-1, keepdims=True)
        return t * jax.lax.rsqrt(var + RMS_EPS) * (1.0 + w.reshape(D))

    q = rms(q, params["q_norm_w"])
    k = rms(k, params["k_norm_w"])

    c = cos[:, None]
    sn = sin[:, None]

    def rope(t):
        d2 = D // 2
        rot = jnp.concatenate([-t[..., d2:], t[..., :d2]], axis=-1)
        return t * c + rot * sn

    q = rope(q)
    k = rope(k)

    k_rep = jnp.repeat(k, N_REP, axis=1)
    v_rep = jnp.repeat(v, N_REP, axis=1)
    scores = jnp.einsum("bhqd,bhkd->bhqk", q.astype(bf16), k_rep.astype(bf16),
                        preferred_element_type=jnp.float32) * SCALING
    scores = scores + mask
    p = jax.nn.softmax(scores.astype(jnp.float32), axis=-1)
    out = jnp.einsum("bhqk,bhkd->bhqd", p.astype(bf16), v_rep.astype(bf16),
                     preferred_element_type=jnp.float32)
    out = out.transpose(0, 2, 1, 3).reshape(Bq * s, NH * D)
    out = mm(out, params["wo"]).reshape(Bq, s, hm)
    return out, p


# ----------------------------------- main ------------------------------------
if __name__ == "__main__":
    key = jax.random.PRNGKey(0)
    keys = jax.random.split(key, 8)
    scale = 0.05

    params = {
        # torch nn.Linear weights are (out, in); we store the transposed (in, out)
        "wq": jax.random.normal(keys[0], (HIDDEN, NH * D), jnp.float32) * scale,
        "wk": jax.random.normal(keys[1], (HIDDEN, NKV * D), jnp.float32) * scale,
        "wv": jax.random.normal(keys[2], (HIDDEN, NKV * D), jnp.float32) * scale,
        "wo": jax.random.normal(keys[3], (NH * D, HIDDEN), jnp.float32) * scale,
        # Gemma3RMSNorm init is zeros; small deterministic values exercise the path
        "q_norm_w": jax.random.normal(keys[4], (1, D), jnp.float32) * 0.1,
        "k_norm_w": jax.random.normal(keys[5], (1, D), jnp.float32) * 0.1,
    }

    hidden_states = jax.random.normal(keys[6], (B, S, HIDDEN), jnp.float32)

    # rotary position embeddings (cos, sin): shape (B, S, D)
    pos = jnp.arange(S, dtype=jnp.float32)
    inv_freq = 1.0 / (10000.0 ** (jnp.arange(0, D, 2, dtype=jnp.float32) / D))
    freqs = jnp.outer(pos, inv_freq)                       # (S, D/2)
    emb = jnp.concatenate([freqs, freqs], axis=-1)         # (S, D)
    cos = jnp.broadcast_to(jnp.cos(emb), (B, S, D))
    sin = jnp.broadcast_to(jnp.sin(emb), (B, S, D))

    # additive causal attention mask (B, 1, S, S): 0 allowed, -1e9 masked
    causal = jnp.tril(jnp.ones((S, S), dtype=bool))
    attention_mask = jnp.where(causal, 0.0, NEG_INF).astype(jnp.float32)
    attention_mask = jnp.broadcast_to(attention_mask[None, None], (B, 1, S, S))

    out, attn_w = gemma3_attention_forward(params, hidden_states, cos, sin, attention_mask)
    out = jax.block_until_ready(out)
    attn_w = jax.block_until_ready(attn_w)

    ref_out, ref_w = reference(params, hidden_states, cos, sin, attention_mask)

    assert out.shape == (B, S, HIDDEN)
    assert attn_w.shape == (B, NH, S, S)
    # bf16-MXU / f32-accumulate in both kernel and reference; tolerance covers
    # accumulation-order and rounding-boundary differences between Mosaic & XLA.
    assert jnp.allclose(out, ref_out, atol=2e-3, rtol=2e-3)
    assert jnp.allclose(attn_w, ref_w, atol=2e-3, rtol=2e-3)

    print("KERNEL_OK")
</pallas_src>

<mosaic_0001>
module attributes {stable_mosaic.version = 11 : i64} {
  func.func @_gemma3_attn_kernel(%arg0: i32, %arg1: memref<16x32xf32, #tpu.memory_space<vmem>>, %arg2: memref<32x128xf32, #tpu.memory_space<vmem>>, %arg3: memref<64x32xf32, #tpu.memory_space<vmem>>, %arg4: memref<1x16xf32, #tpu.memory_space<vmem>>, %arg5: memref<1x16xf32, #tpu.memory_space<vmem>>, %arg6: memref<16x16xf32, #tpu.memory_space<vmem>>, %arg7: memref<16x16xf32, #tpu.memory_space<vmem>>, %arg8: memref<64x64xf32, #tpu.memory_space<vmem>>, %arg9: memref<16x32xf32, #tpu.memory_space<vmem>>, %arg10: memref<64x8xf32, #tpu.memory_space<vmem>>) attributes {dimension_semantics = [#tpu.dimension_semantics<arbitrary>], iteration_bounds = array<i64: 1>, scalar_prefetch = 0 : i64, scratch_operands = 0 : i64, tpu.core_type = #tpu.core_type<tc>, window_params = [{pipeline_mode = #tpu.pipeline_mode<synchronous>, transform_indices = @transform_0, window_bounds = array<i64: 16, 32>}, {pipeline_mode = #tpu.pipeline_mode<synchronous>, transform_indices = @transform_1, window_bounds = array<i64: 32, 128>}, {pipeline_mode = #tpu.pipeline_mode<synchronous>, transform_indices = @transform_2, window_bounds = array<i64: 64, 32>}, {pipeline_mode = #tpu.pipeline_mode<synchronous>, transform_indices = @transform_3, window_bounds = array<i64: 1, 16>}, {pipeline_mode = #tpu.pipeline_mode<synchronous>, transform_indices = @transform_4, window_bounds = array<i64: 1, 16>}, {pipeline_mode = #tpu.pipeline_mode<synchronous>, transform_indices = @transform_5, window_bounds = array<i64: 16, 16>}, {pipeline_mode = #tpu.pipeline_mode<synchronous>, transform_indices = @transform_6, window_bounds = array<i64: 16, 16>}, {pipeline_mode = #tpu.pipeline_mode<synchronous>, transform_indices = @transform_7, window_bounds = array<i64: 64, 64>}, {pipeline_mode = #tpu.pipeline_mode<synchronous>, transform_indices = @transform_8, window_bounds = array<i64: 16, 32>}, {pipeline_mode = #tpu.pipeline_mode<synchronous>, transform_indices = @transform_9, window_bounds = array<i64: 64, 8>}]} {
    %c0 = arith.constant 0 : index
    %c0_0 = arith.constant 0 : index
    %0 = vector.load %arg1[%c0, %c0_0] : memref<16x32xf32, #tpu.memory_space<vmem>>, vector<16x32xf32>
    %1 = arith.truncf %0 : vector<16x32xf32> to vector<16x32xbf16>
    %c0_1 = arith.constant 0 : index
    %c0_2 = arith.constant 0 : index
    %2 = vector.load %arg2[%c0_1, %c0_2] : memref<32x128xf32, #tpu.memory_space<vmem>>, vector<32x128xf32>
    %3 = arith.truncf %2 : vector<32x128xf32> to vector<32x128xbf16>
    %cst = arith.constant dense<0.000000e+00> : vector<16x128xf32>
    %4 = tpu.matmul %1, %3, %cst {dimension_numbers = #tpu.dot_dimension_numbers<[1], [0], [0], [1], [0, 0, 1, 1], [], []>} : vector<16x32xbf16>, vector<32x128xbf16>, vector<16x128xf32> -> vector<16x128xf32>
    %c0_3 = arith.constant 0 : index
    %c0_4 = arith.constant 0 : index
    %5 = vector.load %arg6[%c0_3, %c0_4] : memref<16x16xf32, #tpu.memory_space<vmem>>, vector<16x16xf32>
    %c0_5 = arith.constant 0 : index
    %c0_6 = arith.constant 0 : index
    %6 = vector.load %arg7[%c0_5, %c0_6] : memref<16x16xf32, #tpu.memory_space<vmem>>, vector<16x16xf32>
    %7 = tpu.concatenate %5, %5, %5, %5 in 0 : vector<16x16xf32>, vector<16x16xf32>, vector<16x16xf32>, vector<16x16xf32> -> vector<64x16xf32>
    %8 = tpu.concatenate %6, %6, %6, %6 in 0 : vector<16x16xf32>, vector<16x16xf32>, vector<16x16xf32>, vector<16x16xf32> -> vector<64x16xf32>
    %9 = vector.extract_strided_slice %7 {offsets = [0, 0], sizes = [32, 16], strides = [1, 1]} : vector<64x16xf32> to vector<32x16xf32>
    %10 = vector.extract_strided_slice %8 {offsets = [0, 0], sizes = [32, 16], strides = [1, 1]} : vector<64x16xf32> to vector<32x16xf32>
    %11 = vector.extract_strided_slice %4 {offsets = [0, 0], sizes = [16, 16], strides = [1, 1]} : vector<16x128xf32> to vector<16x16xf32>
    %12 = vector.extract_strided_slice %4 {offsets = [0, 16], sizes = [16, 16], strides = [1, 1]} : vector<16x128xf32> to vector<16x16xf32>
    %13 = vector.extract_strided_slice %4 {offsets = [0, 32], sizes = [16, 16], strides = [1, 1]} : vector<16x128xf32> to vector<16x16xf32>
    %14 = vector.extract_strided_slice %4 {offsets = [0, 48], sizes = [16, 16], strides = [1, 1]} : vector<16x128xf32> to vector<16x16xf32>
    %15 = tpu.concatenate %11, %12, %13, %14 in 0 : vector<16x16xf32>, vector<16x16xf32>, vector<16x16xf32>, vector<16x16xf32> -> vector<64x16xf32>
    %16 = vector.extract_strided_slice %4 {offsets = [0, 64], sizes = [16, 16], strides = [1, 1]} : vector<16x128xf32> to vector<16x16xf32>
    %17 = vector.extract_strided_slice %4 {offsets = [0, 80], sizes = [16, 16], strides = [1, 1]} : vector<16x128xf32> to vector<16x16xf32>
    %18 = tpu.concatenate %16, %17 in 0 : vector<16x16xf32>, vector<16x16xf32> -> vector<32x16xf32>
    %19 = vector.extract_strided_slice %4 {offsets = [0, 96], sizes = [16, 16], strides = [1, 1]} : vector<16x128xf32> to vector<16x16xf32>
    %20 = vector.extract_strided_slice %4 {offsets = [0, 96], sizes = [16, 16], strides = [1, 1]} : vector<16x128xf32> to vector<16x16xf32>
    %21 = vector.extract_strided_slice %4 {offsets = [0, 112], sizes = [16, 16], strides = [1, 1]} : vector<16x128xf32> to vector<16x16xf32>
    %22 = vector.extract_strided_slice %4 {offsets = [0, 112], sizes = [16, 16], strides = [1, 1]} : vector<16x128xf32> to vector<16x16xf32>
    %23 = tpu.concatenate %19, %20, %21, %22 in 0 : vector<16x16xf32>, vector<16x16xf32>, vector<16x16xf32>, vector<16x16xf32> -> vector<64x16xf32>
    %c0_7 = arith.constant 0 : index
    %c0_8 = arith.constant 0 : index
    %24 = vector.load %arg4[%c0_7, %c0_8] : memref<1x16xf32, #tpu.memory_space<vmem>>, vector<1x16xf32>
    %cst_9 = arith.constant 1.000000e+00 : f32
    %25 = vector.broadcast %cst_9 : f32 to vector<1x16xf32>
    %26 = arith.addf %25, %24 : vector<1x16xf32>
    %cst_10 = arith.constant 6.250000e-02 : f32
    %27 = vector.broadcast %cst_10 : f32 to vector<1x16xf32>
    %28 = arith.mulf %26, %27 : vector<1x16xf32>
    %c0_11 = arith.constant 0 : index
    %c0_12 = arith.constant 0 : index
    %29 = vector.load %arg5[%c0_11, %c0_12] : memref<1x16xf32, #tpu.memory_space<vmem>>, vector<1x16xf32>
    %cst_13 = arith.constant 1.000000e+00 : f32
    %30 = vector.broadcast %cst_13 : f32 to vector<1x16xf32>
    %31 = arith.addf %30, %29 : vector<1x16xf32>
    %32 = arith.mulf %15, %15 : vector<64x16xf32>
    %cst_14 = arith.constant dense<0.000000e+00> : vector<64xf32>
    %33 = vector.multi_reduction <add>, %32, %cst_14 [1] : vector<64x16xf32> to vector<64xf32>
    %34 = vector.shape_cast %33 : vector<64xf32> to vector<64x1xf32>
    %cst_15 = arith.constant 1.600000e+01 : f32
    %35 = vector.broadcast %cst_15 : f32 to vector<64x1xf32>
    %36 = arith.divf %34, %35 : vector<64x1xf32>
    %cst_16 = arith.constant 9.99999997E-7 : f32
    %37 = vector.broadcast %cst_16 : f32 to vector<64x1xf32>
    %38 = arith.addf %36, %37 : vector<64x1xf32>
    %39 = math.rsqrt %38 : vector<64x1xf32>
    %40 = vector.broadcast %39 : vector<64x1xf32> to vector<64x16xf32>
    %41 = arith.mulf %15, %40 : vector<64x16xf32>
    %42 = vector.broadcast %28 : vector<1x16xf32> to vector<64x16xf32>
    %43 = arith.mulf %41, %42 : vector<64x16xf32>
    %44 = vector.extract_strided_slice %43 {offsets = [0, 8], sizes = [64, 8], strides = [1, 1]} : vector<64x16xf32> to vector<64x8xf32>
    %cst_17 = arith.constant 0.000000e+00 : f32
    %45 = vector.broadcast %cst_17 : f32 to vector<64x8xf32>
    %46 = arith.subf %45, %44 : vector<64x8xf32>
    %47 = vector.extract_strided_slice %43 {offsets = [0, 0], sizes = [64, 8], strides = [1, 1]} : vector<64x16xf32> to vector<64x8xf32>
    %48 = tpu.concatenate %46, %47 in 1 : vector<64x8xf32>, vector<64x8xf32> -> vector<64x16xf32>
    %49 = arith.mulf %43, %7 : vector<64x16xf32>
    %50 = arith.mulf %48, %8 : vector<64x16xf32>
    %51 = arith.addf %49, %50 : vector<64x16xf32>
    %52 = arith.mulf %18, %18 : vector<32x16xf32>
    %cst_18 = arith.constant dense<0.000000e+00> : vector<32xf32>
    %53 = vector.multi_reduction <add>, %52, %cst_18 [1] : vector<32x16xf32> to vector<32xf32>
    %54 = vector.shape_cast %53 : vector<32xf32> to vector<32x1xf32>
    %cst_19 = arith.constant 1.600000e+01 : f32
    %55 = vector.broadcast %cst_19 : f32 to vector<32x1xf32>
    %56 = arith.divf %54, %55 : vector<32x1xf32>
    %cst_20 = arith.constant 9.99999997E-7 : f32
    %57 = vector.broadcast %cst_20 : f32 to vector<32x1xf32>
    %58 = arith.addf %56, %57 : vector<32x1xf32>
    %59 = math.rsqrt %58 : vector<32x1xf32>
    %60 = vector.broadcast %59 : vector<32x1xf32> to vector<32x16xf32>
    %61 = arith.mulf %18, %60 : vector<32x16xf32>
    %62 = vector.broadcast %31 : vector<1x16xf32> to vector<32x16xf32>
    %63 = arith.mulf %61, %62 : vector<32x16xf32>
    %64 = vector.extract_strided_slice %63 {offsets = [0, 8], sizes = [32, 8], strides = [1, 1]} : vector<32x16xf32> to vector<32x8xf32>
    %cst_21 = arith.constant 0.000000e+00 : f32
    %65 = vector.broadcast %cst_21 : f32 to vector<32x8xf32>
    %66 = arith.subf %65, %64 : vector<32x8xf32>
    %67 = vector.extract_strided_slice %63 {offsets = [0, 0], sizes = [32, 8], strides = [1, 1]} : vector<32x16xf32> to vector<32x8xf32>
    %68 = tpu.concatenate %66, %67 in 1 : vector<32x8xf32>, vector<32x8xf32> -> vector<32x16xf32>
    %69 = arith.mulf %63, %9 : vector<32x16xf32>
    %70 = arith.mulf %68, %10 : vector<32x16xf32>
    %71 = arith.addf %69, %70 : vector<32x16xf32>
    %72 = vector.extract_strided_slice %71 {offsets = [0, 0], sizes = [16, 16], strides = [1, 1]} : vector<32x16xf32> to vector<16x16xf32>
    %73 = vector.extract_strided_slice %71 {offsets = [0, 0], sizes = [16, 16], strides = [1, 1]} : vector<32x16xf32> to vector<16x16xf32>
    %74 = vector.extract_strided_slice %71 {offsets = [16, 0], sizes = [16, 16], strides = [1, 1]} : vector<32x16xf32> to vector<16x16xf32>
    %75 = vector.extract_strided_slice %71 {offsets = [16, 0], sizes = [16, 16], strides = [1, 1]} : vector<32x16xf32> to vector<16x16xf32>
    %76 = tpu.concatenate %72, %73, %74, %75 in 0 : vector<16x16xf32>, vector<16x16xf32>, vector<16x16xf32>, vector<16x16xf32> -> vector<64x16xf32>
    %77 = arith.truncf %51 : vector<64x16xf32> to vector<64x16xbf16>
    %78 = arith.truncf %76 : vector<64x16xf32> to vector<64x16xbf16>
    %cst_22 = arith.constant dense<0.000000e+00> : vector<64x64xf32>
    %79 = tpu.matmul %77, %78, %cst_22 {dimension_numbers = #tpu.dot_dimension_numbers<[1], [1], [0], [0], [0, 0, 1, 0], [], []>} : vector<64x16xbf16>, vector<64x16xbf16>, vector<64x64xf32> -> vector<64x64xf32>
    %c0_23 = arith.constant 0 : index
    %c0_24 = arith.constant 0 : index
    %80 = vector.load %arg8[%c0_23, %c0_24] : memref<64x64xf32, #tpu.memory_space<vmem>>, vector<64x64xf32>
    %81 = arith.addf %79, %80 : vector<64x64xf32>
    %cst_25 = arith.constant dense<0xFF800000> : vector<64xf32>
    %82 = vector.multi_reduction <maximumf>, %81, %cst_25 [1] : vector<64x64xf32> to vector<64xf32>
    %83 = vector.shape_cast %82 : vector<64xf32> to vector<64x1xf32>
    %84 = vector.broadcast %83 : vector<64x1xf32> to vector<64x64xf32>
    %85 = arith.subf %81, %84 : vector<64x64xf32>
    %86 = math.exp %85 : vector<64x64xf32>
    %cst_26 = arith.constant dense<0.000000e+00> : vector<64xf32>
    %87 = vector.multi_reduction <add>, %86, %cst_26 [1] : vector<64x64xf32> to vector<64xf32>
    %88 = vector.shape_cast %87 : vector<64xf32> to vector<64x1xf32>
    %89 = tpu.reciprocal %88 : vector<64x1xf32> -> vector<64x1xf32>
    %90 = vector.broadcast %89 : vector<64x1xf32> to vector<64x64xf32>
    %91 = arith.mulf %86, %90 : vector<64x64xf32>
    %92 = vector.extract_strided_slice %91 {offsets = [0, 0], sizes = [8, 8], strides = [1, 1]} : vector<64x64xf32> to vector<8x8xf32>
    %93 = vector.extract_strided_slice %91 {offsets = [8, 8], sizes = [8, 8], strides = [1, 1]} : vector<64x64xf32> to vector<8x8xf32>
    %94 = vector.extract_strided_slice %91 {offsets = [16, 16], sizes = [8, 8], strides = [1, 1]} : vector<64x64xf32> to vector<8x8xf32>
    %95 = vector.extract_strided_slice %91 {offsets = [24, 24], sizes = [8, 8], strides = [1, 1]} : vector<64x64xf32> to vector<8x8xf32>
    %96 = vector.extract_strided_slice %91 {offsets = [32, 32], sizes = [8, 8], strides = [1, 1]} : vector<64x64xf32> to vector<8x8xf32>
    %97 = vector.extract_strided_slice %91 {offsets = [40, 40], sizes = [8, 8], strides = [1, 1]} : vector<64x64xf32> to vector<8x8xf32>
    %98 = vector.extract_strided_slice %91 {offsets = [48, 48], sizes = [8, 8], strides = [1, 1]} : vector<64x64xf32> to vector<8x8xf32>
    %99 = vector.extract_strided_slice %91 {offsets = [56, 56], sizes = [8, 8], strides = [1, 1]} : vector<64x64xf32> to vector<8x8xf32>
    %100 = tpu.concatenate %92, %93, %94, %95, %96, %97, %98, %99 in 0 : vector<8x8xf32>, vector<8x8xf32>, vector<8x8xf32>, vector<8x8xf32>, vector<8x8xf32>, vector<8x8xf32>, vector<8x8xf32>, vector<8x8xf32> -> vector<64x8xf32>
    %c0_27 = arith.constant 0 : index
    %c0_28 = arith.constant 0 : index
    %101 = vector.load %arg10[%c0_27, %c0_28] : memref<64x8xf32, #tpu.memory_space<vmem>>, vector<64x8xf32>
    tpu.vector_store %arg10[%c0_27, %c0_28], %100 {strides = array<i32>} : memref<64x8xf32, #tpu.memory_space<vmem>>, vector<64x8xf32>,
    %102 = arith.truncf %91 : vector<64x64xf32> to vector<64x64xbf16>
    %103 = arith.truncf %23 : vector<64x16xf32> to vector<64x16xbf16>
    %cst_29 = arith.constant dense<0.000000e+00> : vector<64x16xf32>
    %104 = tpu.matmul %102, %103, %cst_29 {dimension_numbers = #tpu.dot_dimension_numbers<[1], [0], [0], [1], [0, 0, 1, 1], [], []>} : vector<64x64xbf16>, vector<64x16xbf16>, vector<64x16xf32> -> vector<64x16xf32>
    %105 = vector.extract_strided_slice %104 {offsets = [0, 0], sizes = [16, 16], strides = [1, 1]} : vector<64x16xf32> to vector<16x16xf32>
    %106 = vector.extract_strided_slice %104 {offsets = [16, 0], sizes = [16, 16], strides = [1, 1]} : vector<64x16xf32> to vector<16x16xf32>
    %107 = vector.extract_strided_slice %104 {offsets = [32, 0], sizes = [16, 16], strides = [1, 1]} : vector<64x16xf32> to vector<16x16xf32>
    %108 = vector.extract_strided_slice %104 {offsets = [48, 0], sizes = [16, 16], strides = [1, 1]} : vector<64x16xf32> to vector<16x16xf32>
    %109 = tpu.concatenate %105, %106, %107, %108 in 1 : vector<16x16xf32>, vector<16x16xf32>, vector<16x16xf32>, vector<16x16xf32> -> vector<16x64xf32>
    %110 = arith.truncf %109 : vector<16x64xf32> to vector<16x64xbf16>
    %c0_30 = arith.constant 0 : index
    %c0_31 = arith.constant 0 : index
    %111 = vector.load %arg3[%c0_30, %c0_31] : memref<64x32xf32, #tpu.memory_space<vmem>>, vector<64x32xf32>
    %112 = arith.truncf %111 : vector<64x32xf32> to vector<64x32xbf16>
    %cst_32 = arith.constant dense<0.000000e+00> : vector<16x32xf32>
    %113 = tpu.matmul %110, %112, %cst_32 {dimension_numbers = #tpu.dot_dimension_numbers<[1], [0], [0], [1], [0, 0, 1, 1], [], []>} : vector<16x64xbf16>, vector<64x32xbf16>, vector<16x32xf32> -> vector<16x32xf32>
    %c0_33 = arith.constant 0 : index
    %c0_34 = arith.constant 0 : index
    %114 = vector.load %arg9[%c0_33, %c0_34] : memref<16x32xf32, #tpu.memory_space<vmem>>, vector<16x32xf32>
    tpu.vector_store %arg9[%c0_33, %c0_34], %113 {strides = array<i32>} : memref<16x32xf32, #tpu.memory_space<vmem>>, vector<16x32xf32>,
    return
  }
  func.func @transform_0(%arg0: i32) -> (i32, i32) {
    %c0_i32 = arith.constant 0 : i32
    %c0_i32_0 = arith.constant 0 : i32
    %c0_i32_1 = arith.constant 0 : i32
    return %c0_i32, %c0_i32_0 : i32, i32
  }
  func.func @transform_1(%arg0: i32) -> (i32, i32) {
    %c0_i32 = arith.constant 0 : i32
    %c0_i32_0 = arith.constant 0 : i32
    %c0_i32_1 = arith.constant 0 : i32
    return %c0_i32, %c0_i32_0 : i32, i32
  }
  func.func @transform_2(%arg0: i32) -> (i32, i32) {
    %c0_i32 = arith.constant 0 : i32
    %c0_i32_0 = arith.constant 0 : i32
    %c0_i32_1 = arith.constant 0 : i32
    return %c0_i32, %c0_i32_0 : i32, i32
  }
  func.func @transform_3(%arg0: i32) -> (i32, i32) {
    %c0_i32 = arith.constant 0 : i32
    %c0_i32_0 = arith.constant 0 : i32
    %c0_i32_1 = arith.constant 0 : i32
    return %c0_i32, %c0_i32_0 : i32, i32
  }
  func.func @transform_4(%arg0: i32) -> (i32, i32) {
    %c0_i32 = arith.constant 0 : i32
    %c0_i32_0 = arith.constant 0 : i32
    %c0_i32_1 = arith.constant 0 : i32
    return %c0_i32, %c0_i32_0 : i32, i32
  }
  func.func @transform_5(%arg0: i32) -> (i32, i32) {
    %c0_i32 = arith.constant 0 : i32
    %c0_i32_0 = arith.constant 0 : i32
    %c0_i32_1 = arith.constant 0 : i32
    return %c0_i32, %c0_i32_0 : i32, i32
  }
  func.func @transform_6(%arg0: i32) -> (i32, i32) {
    %c0_i32 = arith.constant 0 : i32
    %c0_i32_0 = arith.constant 0 : i32
    %c0_i32_1 = arith.constant 0 : i32
    return %c0_i32, %c0_i32_0 : i32, i32
  }
  func.func @transform_7(%arg0: i32) -> (i32, i32) {
    %c0_i32 = arith.constant 0 : i32
    %c0_i32_0 = arith.constant 0 : i32
    %c0_i32_1 = arith.constant 0 : i32
    return %c0_i32, %c0_i32_0 : i32, i32
  }
  func.func @transform_8(%arg0: i32) -> (i32, i32) {
    %c0_i32 = arith.constant 0 : i32
    %c0_i32_0 = arith.constant 0 : i32
    %c0_i32_1 = arith.constant 0 : i32
    return %c0_i32, %c0_i32_0 : i32, i32
  }
  func.func @transform_9(%arg0: i32) -> (i32, i32) {
    %c0_i32 = arith.constant 0 : i32
    %c0_i32_0 = arith.constant 0 : i32
    %c0_i32_1 = arith.constant 0 : i32
    return %c0_i32, %c0_i32_0 : i32, i32
  }
}

</mosaic_0001>

<bundles_post_ra>
// kernel: tpu_custom_call.1
= control target key start
LH: loop header
LB: loop body
LE: loop exit
PB: predicated region body
PF: predicated region fallthrough
CT: control target
= control target key end

     0   :  { %15 = vsyncpa [#allocation3], 0  ;;  %s1678_s0 = inlined_call_operand.vmem [shape: f32[16,32], index: 0, kind: input, shape index: {}]   ;;  %s1679_s1 = inlined_call_operand.vmem [shape: f32[32,128], index: 1, kind: input, shape index: {}]   ;;  %s1680_s2 = inlined_call_operand.vmem [shape: f32[64,32], index: 2, kind: input, shape index: {}]   ;;  %s1681_s3 = inlined_call_operand.vmem [shape: f32[1,16], index: 3, kind: input, shape index: {}]   ;;  %s1682_s4 = inlined_call_operand.vmem [shape: f32[1,16], index: 4, kind: input, shape index: {}]   ;;  %s1683_s5 = inlined_call_operand.hbm [shape: f32[16,16], index: 5, kind: input, shape index: {}]   ;;  %s1684_s6 = inlined_call_operand.hbm [shape: f32[16,16], index: 6, kind: input, shape index: {}]   ;;  %s1685_s7 = inlined_call_operand.vmem [shape: f32[64,64], index: 7, kind: input, shape index: {}]   ;;  %s1686_s8 = inlined_call_operand.hbm [shape: f32[16,32], index: 8, kind: output, shape index: {0}]   ;;  %s1687_s9 = inlined_call_operand.vmem [shape: f32[64,8], index: 9, kind: output, shape index: {1}]  }
   0x1   :  { %16 = vsyncpa [#allocation6], 0 }
   0x2   :  { %17 = vsyncpa [#allocation4], 0  ;;  %s1144_s30 = smov [#allocation2]   ;;  %s1072_s13 = scalar_lea.hbm %s1683_s5, 256 }
   0x3   :  { %s33_s10 = sshll.u32 %s1144_s30, 4  ;;  %p1073_p0 = scmp.ne.s32.totalorder %s1683_s5, %s1072_s13  ;;  %s34_s10 = int_to_ptr.vmem [resolvable:$true] %s33_s10 }
   0x4   :  { %p1076_p1 = scmp.lt.u32.totalorder %s1072_s13, %s1683_s5 }
   0x6   :  { %p1078_p2 = pnand %p1076_p1, %p1073_p0 }
   0x8   :  { %1081 = shalt.err (!%p1078_p2)
}
   0x9   :  { %s1082_s18 = scalar_lea.vmem %s34_s10, 256  ;;  %p1087_p4 = scmp.lt.s32.totalorder %s34_s10, %s34_s10 }
   0xa   :  { %p1083_p3 = scmp.ne.s32.totalorder %s34_s10, %s1082_s18  ;;  %p1088_p5 = scmp.lt.s32.totalorder %s1082_s18, %s1082_s18 }
   0xc   :  { %p1089_p6 = por %p1088_p5, %p1087_p4 }
   0xe   :  { %p1090_p7 = pnand %p1089_p6, %p1083_p3 }
  0x10   :  { %1093 = shalt.err (!%p1090_p7)
}
  0x11   :  { %s1145_s19 = smov 128   ;;  %s1146_s20 = smov 8  }
  0x12   :  { %39 = dma.hbm_to_vmem [thread:$0]  %s1683_s5, 256, %s34_s10, [#allocation3], %s1145_s19, %s1145_s19, %s1146_s20  }
  0x13   :  { %s1147_s23 = smov [#allocation5]   ;;  %s1094_s27 = scalar_lea.hbm %s1684_s6, 256 }
  0x14   :  { %s45_s24 = sshll.u32 %s1147_s23, 4  ;;  %p1095_p8 = scmp.ne.s32.totalorder %s1684_s6, %s1094_s27  ;;  %s46_s24 = int_to_ptr.vmem [resolvable:$true] %s45_s24 }
  0x15   :  { %p1098_p9 = scmp.lt.u32.totalorder %s1094_s27, %s1684_s6 }
  0x17   :  { %p1100_p10 = pnand %p1098_p9, %p1095_p8 }
  0x19   :  { %1103 = shalt.err (!%p1100_p10)
}
  0x1a   :  { %s1104_s12 = scalar_lea.vmem %s46_s24, 256  ;;  %p1109_p12 = scmp.lt.s32.totalorder %s46_s24, %s46_s24 }
  0x1b   :  { %p1105_p11 = scmp.ne.s32.totalorder %s46_s24, %s1104_s12  ;;  %p1110_p13 = scmp.lt.s32.totalorder %s1104_s12, %s1104_s12 }
  0x1d   :  { %p1111_p0 = por %p1110_p13, %p1109_p12 }
  0x1f   :  { %p1112_p1 = pnand %p1111_p0, %p1105_p11 }
  0x21   :  { %1115 = shalt.err (!%p1112_p1)
}
  0x22   :  { %51 = dma.hbm_to_vmem [thread:$0]  %s1684_s6, 256, %s46_s24, [#allocation6], %s1145_s19, %s1145_s19, %s1146_s20  }
  0x23   :  { %1138 = dma.done.wait [#allocation3], 256  }
  0x24   :  { %1139 = vsyncadd [#allocation3], 4294967040 }
  0x25   :  { %1140 = dma.done.wait [#allocation6], 256  }
  0x26   :  { %1141 = vsyncadd [#allocation6], 4294967040  ;;  %v211_v0 = vlaneseq  ;;  %v1148_v1 = vmov 0.0   ;;  %vm1149_vm0 = vmmov 0   ;;  %v64_v3 = vld [vmem:[%s1679_s1] sm:$0xff]  ;;  %v65_v4 = vld [vmem:[%s1679_s1 + $0x8] sm:$0xff] }
  0x27   :  { %926 = vmatprep.subr.bf16.mxu0 %v1148_v1  ;;  %930 = vmatprep.mubr.msk.bf16.mxu0 %vm1149_vm0, %v1148_v1  ;;  %v66_v5 = vld [vmem:[%s1679_s1 + $0x10] sm:$0xff]  ;;  %v68_v6 = vpack.c.bf16 %v65_v4, %v64_v3  ;;  %v67_v7 = vld [vmem:[%s1679_s1 + $0x18] sm:$0xff]  ;;  %v142_v9 = vld [vmem:[%s1682_s4] sm:$0x1]  ;;  %vm70_vm1 = vcmask 261120   ;;  %s1150_s1 = smov 64  }
  0x28   :  { %v1246_v2 = vshrl.u32 %v211_v0, 7  ;;  %v69_v10 = vpack.c.bf16 %v67_v7, %v66_v5  ;;  %v61_v11 = vld [vmem:[%s1678_s0] sm:$0xff]  ;;  %v62_v12 = vld [vmem:[%s1678_s0 + $0x8] sm:$0xff]  ;;  %v143_v13 = vadd.f32 1.0, %v142_v9  ;;  %s1151_s4 = smov 96   ;;  %s1152_s0 = smov 112  }
  0x29   :  { %927 = vmatpush3.bf16.msra.mxu0 %v68_v6  ;;  %v63_v15 = vpack.c.bf16 %v62_v12, %v61_v11  ;;  %vm152_vm2 = vcmask 130048   ;;  %s1153_s28 = smov 80   ;;  %v1320_v37 = vld [vmem:[#allocation2 + $0x8] sm:$0xff]  ;;  %v1327_v43 = vld [vmem:[#allocation2] sm:$0xff]  ;;  %s1154_s29 = smov 72   ;;  %vm296_vm3 = vcmask 64512  }
  0x2a   :  { %v213_v8 = vsub.s32 0, %v1246_v2  ;;  %928 = vmatprep.subr.bf16.mxu0 %v1148_v1  ;;  %s1155_s30 = smov 56   ;;  %vm564_vm4 = vcmask 523264   ;;  %s1158_s26 = smov 16   ;;  %vm808_vm5 = vcmask 392192  }
  0x2b   :  { %s1159_s27 = smov 48   ;;  %s1162_s6 = smov [#allocation7]  }
  0x2c   :  { %v377_v14 = vrot.slane %v143_v13, %v213_v8  ;;  %s875_s16 = sshll.u32 %s1162_s6, 4  ;;  %s876_s16 = int_to_ptr.vmem [resolvable:$true] %s875_s16 }
  0x2d   :  { %929 = vmatpush3.bf16.msra.mxu0 %v69_v10  ;;  %s1116_s17 = scalar_lea.vmem %s876_s16, 256  ;;  %p1121_p3 = scmp.lt.s32.totalorder %s876_s16, %s876_s16 }
  0x2e   :  { %378 = vrot.lane.b32.xlu1 %v377_v14, %s1150_s1  ;;  %p1117_p2 = scmp.ne.s32.totalorder %s876_s16, %s1116_s17  ;;  %p1122_p4 = scmp.lt.s32.totalorder %s1116_s17, %s1116_s17 }
  0x30   :  { %931 = vmatmul.mubr.msk.bf16.vlgmr.msra.gmra.mrb[0].mxu0 %vm70_vm1, %v63_v15  ;;  %p1123_p5 = por %p1122_p4, %p1121_p3 }
  0x32   :  { %p1124_p6 = pnand %p1123_p5, %p1117_p2 }
  0xa0   :  { %v1305_v27 = vpop.permute.xlu1 %378 }
 0x103   :  { %v1275_v16 = vpop.f32.mrb[0].mxu0 }
 0x104   :  { %127 = vrot.lane.b32.xlu1 %v1275_v16, %s1151_s4  ;;  %121 = vrot.lane.b32.xlu0 %v1275_v16, %s1152_s0  ;;  %v932_v17 = vpop.f32.mrb[1].mxu0  ;;  %v144_v20 = vmul.f32 %v1275_v16, %v1275_v16 }
 0x105   :  { %v1281_v18 = vpop.f32.mrb[2].mxu0 }
 0x106   :  { %v933_v19 = vpop.f32.mrb[3].mxu0  ;;  %v693_v21 = vpack.c.bf16 %v1281_v18, %v1275_v16  ;;  %v145_v22 = vmul.f32 %v1281_v18, %v1281_v18  ;;  %v153_v34 = vsel %vm152_vm2, %v144_v20, 0.0 }
 0x108   :  { %333 = vrot.lane.b32.xlu1 %v144_v20, %s1150_s1  ;;  %123 = vrot.lane.b32.xlu0 %v1281_v18, %s1152_s0  ;;  %v156_v33 = vsel %vm152_vm2, %v145_v22, 0.0 }
 0x10c   :  { %129 = vrot.lane.b32.xlu0 %v1281_v18, %s1151_s4  ;;  %335 = vrot.lane.b32.xlu1 %v145_v22, %s1150_s1 }
 0x176   :  { %v1295_v23 = vpop.permute.xlu0 %121  ;;  %v1307_v28 = vpop.permute.xlu1 %127 }
 0x177   :  { %v146_v24 = vmul.f32 %v1295_v23, %v1295_v23 }
 0x179   :  { %337 = vrot.lane.b32.xlu0 %v146_v24, %s1150_s1  ;;  %v159_v42 = vsel %vm152_vm2, %v146_v24, 0.0 }
 0x17a   :  { %v1300_v25 = vpop.permute.xlu0 %123  ;;  %v334_v29 = vpop.permute.xlu1 %333 }
 0x17b   :  { %v147_v26 = vmul.f32 %v1300_v25, %v1300_v25  ;;  %v345_v30 = vsel %vm152_vm2, %v334_v29, 0.0 }
 0x17d   :  { %339 = vrot.lane.b32.xlu1 %v147_v26, %s1150_s1  ;;  %v162_v35 = vsel %vm152_vm2, %v147_v26, 0.0 }
 0x17e   :  { %v336_v31 = vpop.permute.xlu1 %335  ;;  %v1318_v36 = vpop.permute.xlu0 %129 }
 0x17f   :  { %v348_v32 = vsel %vm152_vm2, %v336_v31, 0.0 }
 0x198   :  { %346 = vadd.xlane.f32.xlu0 %v345_v30 }
 0x1a1   :  { %349 = vadd.xlane.f32.xlu1 %v348_v32 }
 0x1ae   :  { %135 = vrot.lane.b32.xlu0 %v1281_v18, %s1153_s28 }
 0x1b2   :  { %133 = vrot.lane.b32.xlu1 %v1275_v16, %s1153_s28 }
 0x1cd   :  { %157 = vadd.xlane.f32.xlu0 %v156_v33 }
 0x1d6   :  { %154 = vadd.xlane.f32.xlu1 %v153_v34 }
 0x1da   :  { %163 = vadd.xlane.f32.xlu1 %v162_v35 }
 0x1eb   :  { %v338_v38 = vpop.permute.xlu0 %337  ;;  %429 = vrot.lane.b32.xlu1 %v1320_v37, %s1150_s1 }
 0x1ec   :  { %v351_v39 = vsel %vm152_vm2, %v338_v38, 0.0 }
 0x1ed   :  { %352 = vadd.xlane.f32.xlu0 %v351_v39  ;;  %v149_v39 = vmul.f32 %v1318_v36, %v1318_v36 }
 0x1ef   :  { %v340_v40 = vpop.permute.xlu1 %339 }
 0x1f0   :  { %v354_v41 = vsel %vm152_vm2, %v340_v40, 0.0  ;;  %v148_v40 = vmul.f32 %v1307_v28, %v1307_v28 }
 0x1f1   :  { %355 = vadd.xlane.f32.xlu0 %v354_v41  ;;  %v168_v41 = vsel %vm152_vm2, %v149_v39, 0.0 }
 0x1f5   :  { %160 = vadd.xlane.f32.xlu0 %v159_v42 }
 0x20b   :  { %427 = vrot.lane.b32.xlu0 %v1327_v43, %s1150_s1 }
 0x225   :  { %v347_v44 = vpop.xlane.xlu0 %346 }
 0x226   :  { %v357_v45 = vmul.f32 0.0625, %v347_v44 }
 0x228   :  { %v361_v46 = vadd.f32 1e-06, %v357_v45  ;;  %v1378_v45 = vld [vmem:[#allocation5] sm:$0xff] }
 0x229   :  { %v1343_v58 = vpop.permute.xlu0 %135 }
 0x22a   :  { %1016 = vrsqrt.f32 %v361_v46 }
 0x22e   :  { %v350_v47 = vpop.xlane.xlu1 %349 }
 0x22f   :  { %v358_v48 = vmul.f32 0.0625, %v350_v47 }
 0x231   :  { %v362_v49 = vadd.f32 1e-06, %v358_v48 }
 0x232   :  { %v1345_v62 = vpop.permute.xlu1 %133 }
 0x233   :  { %1018 = vrsqrt.f32 %v362_v49 }
 0x234   :  { %v1017_v50 = vpop.eup %1016 }
 0x235   :  { %v369_v51 = vmul.f32 %v1017_v50, %v1275_v16  ;;  %v1382_v50 = vld [vmem:[#allocation5 + $0x8] sm:$0xff] }
 0x237   :  { %v1333_v52 = vmul.f32 %v1305_v27, %v369_v51 }
 0x239   :  { %409 = vrot.lane.b32.xlu1 %v1333_v52, %s1154_s29  ;;  %v385_v53 = vsub.f32 0.0, %v1333_v52 }
 0x23b   :  { %393 = vrot.lane.b32.xlu0 %v385_v53, %s1155_s30 }
 0x23d   :  { %v1019_v54 = vpop.eup %1018 }
 0x23e   :  { %v370_v55 = vmul.f32 %v1019_v54, %v1281_v18  ;;  %v150_v54 = vmul.f32 %v1345_v62, %v1345_v62 }
 0x240   :  { %v382_v56 = vmul.f32 %v1305_v27, %v370_v55  ;;  %v151_v55 = vmul.f32 %v1343_v58, %v1343_v58 }
 0x242   :  { %411 = vrot.lane.b32.xlu0 %v382_v56, %s1154_s29  ;;  %v386_v57 = vsub.f32 0.0, %v382_v56 }
 0x244   :  { %395 = vrot.lane.b32.xlu1 %v386_v57, %s1155_s30  ;;  %v174_v57 = vsel %vm152_vm2, %v151_v55, 0.0 }
 0x25a   :  { %v158_v59 = vpop.xlane.xlu0 %157 }
 0x25b   :  { %v179_v60 = vmul.f32 0.0625, %v158_v59 }
 0x25d   :  { %v187_v61 = vadd.f32 1e-06, %v179_v60  ;;  %v139_v60 = vld [vmem:[%s1681_s3] sm:$0x1]  ;;  %s1156_s3 = smov 120  }
 0x25f   :  { %1020 = vrsqrt.f32 %v187_v61 }
 0x263   :  { %v155_v63 = vpop.xlane.xlu1 %154 }
 0x264   :  { %v178_v0 = vmul.f32 0.0625, %v155_v63  ;;  %v140_v63 = vadd.f32 1.0, %v139_v60 }
 0x266   :  { %v186_v3 = vadd.f32 1e-06, %v178_v0  ;;  %v141_v0 = vmul.f32 0.0625, %v140_v63 }
 0x267   :  { %v164_v4 = vpop.xlane.xlu1 %163 }
 0x268   :  { %1022 = vrsqrt.f32 %v186_v3  ;;  %v181_v59 = vmul.f32 0.0625, %v164_v4 }
 0x269   :  { %v1021_v5 = vpop.eup %1020 }
 0x26a   :  { %v1348_v6 = vmul.f32 %v1021_v5, %v1281_v18  ;;  %v189_v61 = vadd.f32 1e-06, %v181_v59  ;;  %v1399_v5 = vrot.slane %v141_v0, %v213_v8 }
 0x26b   :  { %v430_v7 = vpop.permute.xlu1 %429 }
 0x26c   :  { %v1350_v9 = vmul.f32 %v430_v7, %v382_v56  ;;  %v171_v56 = vsel %vm152_vm2, %v150_v54, 0.0  ;;  %v1405_v4 = vmul.f32 %v1399_v5, %v1348_v6 }
 0x26e   :  { %v225_v8 = vsub.f32 0.0, %v1405_v4 }
 0x272   :  { %v1023_v10 = vpop.eup %1022 }
 0x273   :  { %v1353_v11 = vmul.f32 %v1023_v10, %v1275_v16 }
 0x27a   :  { %v353_v12 = vpop.xlane.xlu0 %352 }
 0x27b   :  { %v359_v13 = vmul.f32 0.0625, %v353_v12 }
 0x27d   :  { %v363_v14 = vadd.f32 1e-06, %v359_v13 }
 0x27e   :  { %v356_v15 = vpop.xlane.xlu0 %355 }
 0x27f   :  { %1024 = vrsqrt.f32 %v363_v14  ;;  %v360_v17 = vmul.f32 0.0625, %v356_v15 }
 0x281   :  { %v364_v19 = vadd.f32 1e-06, %v360_v17 }
 0x282   :  { %v1355_v20 = vpop.xlane.xlu0 %160 }
 0x283   :  { %1026 = vrsqrt.f32 %v364_v19 }
 0x284   :  { %1028 = vrsqrt.f32 %v189_v61 }
 0x286   :  { %v1359_v30 = vpop.permute.xlu0 %427 }
 0x289   :  { %v1025_v22 = vpop.eup %1024 }
 0x28a   :  { %v371_v24 = vmul.f32 %v1025_v22, %v1295_v23 }
 0x28c   :  { %v383_v26 = vmul.f32 %v1305_v27, %v371_v24  ;;  %v180_v24 = vmul.f32 0.0625, %v1355_v20 }
 0x28d   :  { %v1027_v29 = vpop.eup %1026 }
 0x28e   :  { %v1362_v31 = vmul.f32 %v1359_v30, %v383_v26  ;;  %413 = vrot.lane.b32.xlu1 %v383_v26, %s1154_s29  ;;  %v372_v32 = vmul.f32 %v1027_v29, %v1300_v25  ;;  %v387_v33 = vsub.f32 0.0, %v383_v26  ;;  %v1029_v14 = vpop.eup %1028  ;;  %v188_v26 = vadd.f32 1e-06, %v180_v24 }
 0x28f   :  { %v205_v19 = vmul.f32 %v1029_v14, %v1300_v25 }
 0x290   :  { %v384_v34 = vmul.f32 %v1305_v27, %v372_v32  ;;  %v165_v27 = vsel %vm152_vm2, %v148_v40, 0.0  ;;  %1030 = vrsqrt.f32 %v188_v26 }
 0x291   :  { %v1415_v6 = vmul.f32 %v1399_v5, %v205_v19 }
 0x292   :  { %397 = vrot.lane.b32.xlu1 %v387_v33, %s1155_s30  ;;  %415 = vrot.lane.b32.xlu0 %v384_v34, %s1154_s29  ;;  %v1369_v35 = vmul.f32 %v430_v7, %v384_v34  ;;  %v388_v38 = vsub.f32 0.0, %v384_v34  ;;  %v433_v34 = vmul.f32 %v1359_v30, %v1333_v52 }
 0x293   :  { %v227_v22 = vsub.f32 0.0, %v1415_v6 }
 0x296   :  { %399 = vrot.lane.b32.xlu0 %v388_v38, %s1155_s30 }
 0x29a   :  { %v1031_v20 = vpop.eup %1030 }
 0x2ab   :  { %v410_v42 = vpop.permute.xlu1 %409 }
 0x2ad   :  { %v394_v44 = vpop.permute.xlu0 %393 }
 0x2ae   :  { %v421_v46 = vsel %vm296_vm3, %v394_v44, %v410_v42  ;;  %v1427_v44 = vmul.f32 %v1399_v5, %v1353_v11 }
 0x2af   :  { %v437_v48 = vmul.f32 %v421_v46, %v1378_v45 }
 0x2b0   :  { %v224_v46 = vsub.f32 0.0, %v1427_v44 }
 0x2b4   :  { %v412_v49 = vpop.permute.xlu0 %411 }
 0x2b5   :  { %169 = vadd.xlane.f32.xlu0 %v168_v41 }
 0x2b6   :  { %166 = vadd.xlane.f32.xlu1 %v165_v27  ;;  %v396_v47 = vpop.permute.xlu1 %395 }
 0x2b7   :  { %v422_v51 = vsel %vm296_vm3, %v396_v47, %v412_v49  ;;  %v204_v47 = vmul.f32 %v1031_v20, %v1295_v23 }
 0x2b8   :  { %v438_v53 = vmul.f32 %v422_v51, %v1382_v50 }
 0x2b9   :  { %v1434_v52 = vmul.f32 %v1399_v5, %v204_v47 }
 0x2bb   :  { %v226_v30 = vsub.f32 0.0, %v1434_v52 }
 0x2c7   :  { %445 = vrot.lane.b32.xlu1 %v437_v48, %s1150_s1 }
 0x2cb   :  { %447 = vrot.lane.b32.xlu0 %v438_v53, %s1150_s1 }
 0x2ea   :  { %172 = vadd.xlane.f32.xlu0 %v171_v56 }
 0x2eb   :  { %175 = vadd.xlane.f32.xlu1 %v174_v57 }
 0x300   :  { %v414_v3 = vpop.permute.xlu1 %413 }
 0x304   :  { %v398_v7 = vpop.permute.xlu1 %397  ;;  %v416_v10 = vpop.permute.xlu0 %415 }
 0x305   :  { %v423_v12 = vsel %vm296_vm3, %v398_v7, %v414_v3 }
 0x306   :  { %v439_v13 = vmul.f32 %v423_v12, %v1378_v45 }
 0x308   :  { %449 = vrot.lane.b32.xlu0 %v439_v13, %s1150_s1  ;;  %v400_v15 = vpop.permute.xlu0 %399 }
 0x309   :  { %v424_v17 = vsel %vm296_vm3, %v400_v15, %v416_v10 }
 0x30a   :  { %v440_v2 = vmul.f32 %v424_v17, %v1382_v50 }
 0x30c   :  { %242 = vrot.lane.b32.xlu0 %v225_v8, %s1156_s3  ;;  %451 = vrot.lane.b32.xlu1 %v440_v2, %s1150_s1 }
 0x310   :  { %274 = vrot.lane.b32.xlu0 %v1405_v4, %s1146_s20 }
 0x314   :  { %246 = vrot.lane.b32.xlu0 %v227_v22, %s1156_s3 }
 0x342   :  { %v170_v29 = vpop.xlane.xlu0 %169 }
 0x343   :  { %v167_v32 = vpop.xlane.xlu1 %166  ;;  %v183_v51 = vmul.f32 0.0625, %v170_v29 }
 0x344   :  { %v182_v33 = vmul.f32 0.0625, %v167_v32 }
 0x345   :  { %v191_v53 = vadd.f32 1e-06, %v183_v51 }
 0x346   :  { %v190_v38 = vadd.f32 1e-06, %v182_v33  ;;  %v448_v39 = vpop.permute.xlu0 %447 }
 0x347   :  { %v458_v40 = vadd.f32 %v448_v39, %v1350_v9  ;;  %v446_v41 = vpop.permute.xlu1 %445 }
 0x348   :  { %v457_v27 = vadd.f32 %v446_v41, %v433_v34  ;;  %1032 = vrsqrt.f32 %v190_v38  ;;  %v305_v34 = vmul.f32 %v1427_v44, %v1327_v43  ;;  %v306_v38 = vmul.f32 %v1405_v4, %v1320_v37 }
 0x349   :  { %1034 = vrsqrt.f32 %v191_v53 }
 0x34a   :  { %v465_v42 = vpack.c.bf16 %v458_v40, %v457_v27 }
 0x34c   :  { %477 = vrot.lane.b32.xlu1 %v465_v42, %s1150_s1 }
 0x350   :  { %240 = vrot.lane.b32.xlu1 %v224_v46, %s1156_s3 }
 0x352   :  { %v1033_v9 = vpop.eup %1032 }
 0x353   :  { %v206_v11 = vmul.f32 %v1033_v9, %v1307_v28  ;;  %v1035_v61 = vpop.eup %1034 }
 0x354   :  { %272 = vrot.lane.b32.xlu1 %v1427_v44, %s1146_s20  ;;  %v207_v10 = vmul.f32 %v1035_v61, %v1318_v36 }
 0x355   :  { %v1442_v48 = vmul.f32 %v1399_v5, %v206_v11 }
 0x356   :  { %v1455_v12 = vmul.f32 %v1399_v5, %v207_v10 }
 0x357   :  { %v228_v49 = vsub.f32 0.0, %v1442_v48 }
 0x358   :  { %244 = vrot.lane.b32.xlu1 %v226_v30, %s1156_s3  ;;  %v229_v17 = vsub.f32 0.0, %v1455_v12 }
 0x35c   :  { %276 = vrot.lane.b32.xlu1 %v1434_v52, %s1146_s20 }
 0x360   :  { %248 = vrot.lane.b32.xlu1 %v228_v49, %s1156_s3 }
 0x364   :  { %280 = vrot.lane.b32.xlu1 %v1442_v48, %s1146_s20 }
 0x377   :  { %v173_v54 = vpop.xlane.xlu0 %172 }
 0x378   :  { %v184_v28 = vmul.f32 0.0625, %v173_v54  ;;  %v176_v55 = vpop.xlane.xlu1 %175 }
 0x379   :  { %v185_v56 = vmul.f32 0.0625, %v176_v55 }
 0x37a   :  { %v192_v57 = vadd.f32 1e-06, %v184_v28  ;;  %v308_v28 = vmul.f32 %v1415_v6, %v1320_v37 }
 0x37b   :  { %v193_v59 = vadd.f32 1e-06, %v185_v56  ;;  %v450_v60 = vpop.permute.xlu0 %449  ;;  %v307_v56 = vmul.f32 %v1434_v52, %v1327_v43 }
 0x37c   :  { %1036 = vrsqrt.f32 %v192_v57  ;;  %v459_v0 = vadd.f32 %v450_v60, %v1362_v31 }
 0x37d   :  { %1038 = vrsqrt.f32 %v193_v59 }
 0x37e   :  { %v452_v63 = vpop.permute.xlu1 %451 }
 0x37f   :  { %v460_v3 = vadd.f32 %v452_v63, %v1369_v35 }
 0x381   :  { %v466_v7 = vpack.c.bf16 %v460_v3, %v459_v0  ;;  %v309_v0 = vmul.f32 %v1442_v48, %v1327_v43  ;;  %v310_v3 = vmul.f32 %v1455_v12, %v1320_v37 }
 0x383   :  { %479 = vrot.lane.b32.xlu0 %v466_v7, %s1150_s1  ;;  %s1161_s1 = smov 88  }
 0x386   :  { %v1037_v13 = vpop.eup %1036 }
 0x387   :  { %v1039_v14 = vpop.eup %1038  ;;  %278 = vrot.lane.b32.xlu0 %v1415_v6, %s1146_s20  ;;  %v208_v15 = vmul.f32 %v1037_v13, %v1345_v62 }
 0x388   :  { %v209_v35 = vmul.f32 %v1039_v14, %v1343_v58  ;;  %v243_v58 = vpop.permute.xlu0 %242 }
 0x389   :  { %v1462_v31 = vmul.f32 %v1399_v5, %v208_v15 }
 0x38a   :  { %v1469_v2 = vmul.f32 %v1399_v5, %v209_v35 }
 0x38b   :  { %250 = vrot.lane.b32.xlu0 %v229_v17, %s1156_s3  ;;  %v230_v36 = vsub.f32 0.0, %v1462_v31 }
 0x38c   :  { %v231_v62 = vsub.f32 0.0, %v1469_v2  ;;  %v275_v19 = vpop.permute.xlu0 %274 }
 0x38d   :  { %252 = vrot.lane.b32.xlu1 %v230_v36, %s1156_s3  ;;  %v298_v24 = vsel %vm296_vm3, %v243_v58, %v275_v19 }
 0x38e   :  { %v314_v26 = vmul.f32 %v298_v24, %v1382_v50 }
 0x38f   :  { %282 = vrot.lane.b32.xlu0 %v1455_v12, %s1146_s20  ;;  %v311_v12 = vmul.f32 %v1462_v31, %v1327_v43  ;;  %v470_v43 = vld [vmem:[%s1685_s7 + $0x18] sm:$0xff] }
 0x390   :  { %v322_v40 = vadd.f32 %v314_v26, %v306_v38  ;;  %v247_v20 = vpop.permute.xlu0 %246 }
 0x391   :  { %284 = vrot.lane.b32.xlu1 %v1462_v31, %s1146_s20 }
 0x393   :  { %254 = vrot.lane.b32.xlu0 %v231_v62, %s1156_s3  ;;  %v312_v62 = vmul.f32 %v1469_v2, %v1320_v37  ;;  %v468_v37 = vld [vmem:[%s1685_s7 + $0x8] sm:$0xff] }
 0x397   :  { %286 = vrot.lane.b32.xlu0 %v1469_v2, %s1146_s20  ;;  %v469_v2 = vld [vmem:[%s1685_s7 + $0x10] sm:$0xff] }
 0x3be   :  { %v478_v8 = vpop.permute.xlu1 %477 }
 0x3bf   :  { %978 = vmatprep.subr.msk.bf16.mxu1 %vm152_vm2, %v478_v8  ;;  %v494_v5 = vsel %vm152_vm2, %v478_v8, 0 }
 0x3c0   :  { %935 = vmatpush3.bf16.xpose.msra.mxu1 %v494_v5 }
 0x3c1   :  { %979 = vmatprep.subr.msk.bf16.mxu1 %vm152_vm2, %v478_v8 }
 0x3c2   :  { %v241_v22 = vpop.permute.xlu1 %240 }
 0x3c6   :  { %v273_v29 = vpop.permute.xlu1 %272 }
 0x3c7   :  { %v297_v32 = vsel %vm296_vm3, %v241_v22, %v273_v29 }
 0x3c8   :  { %v313_v33 = vmul.f32 %v297_v32, %v1378_v45  ;;  %937 = vmatpush3.bf16.xpose.msra.mxu1 %v494_v5 }
 0x3ca   :  { %v321_v39 = vadd.f32 %v313_v33, %v305_v34  ;;  %v245_v27 = vpop.permute.xlu1 %244 }
 0x3cc   :  { %v461_v41 = vpack.c.bf16 %v322_v40, %v321_v39 }
 0x3ce   :  { %942 = vmatprep.mubr.msk.bf16.mxu1 %vm152_vm2, %v461_v41  ;;  %v277_v42 = vpop.permute.xlu1 %276  ;;  %v471_v41 = vld [vmem:[%s1685_s7 + $0x20] sm:$0xff] }
 0x3cf   :  { %v299_v30 = vsel %vm296_vm3, %v245_v27, %v277_v42  ;;  %v473_v42 = vld [vmem:[%s1685_s7 + $0x30] sm:$0xff] }
 0x3d0   :  { %v315_v53 = vmul.f32 %v299_v30, %v1378_v45 }
 0x3d2   :  { %v249_v46 = vpop.permute.xlu1 %248  ;;  %v323_v61 = vadd.f32 %v315_v53, %v307_v56 }
 0x3d6   :  { %v281_v11 = vpop.permute.xlu1 %280 }
 0x3d7   :  { %v301_v54 = vsel %vm296_vm3, %v249_v46, %v281_v11  ;;  %v472_v46 = vld [vmem:[%s1685_s7 + $0x28] sm:$0xff] }
 0x3d8   :  { %v317_v59 = vmul.f32 %v301_v54, %v1378_v45 }
 0x3da   :  { %v325_v13 = vadd.f32 %v317_v59, %v309_v0 }
 0x3f5   :  { %v480_v47 = vpop.permute.xlu0 %479 }
 0x3f6   :  { %980 = vmatprep.subr.msk.bf16.mxu1 %vm152_vm2, %v480_v47  ;;  %v497_v9 = vsel %vm152_vm2, %v480_v47, 0 }
 0x3f7   :  { %939 = vmatpush3.bf16.xpose.msra.mxu1 %v497_v9 }
 0x3f8   :  { %981 = vmatprep.subr.msk.bf16.mxu1 %vm152_vm2, %v480_v47 }
 0x3f9   :  { %v279_v44 = vpop.permute.xlu0 %278 }
 0x3fa   :  { %v300_v4 = vsel %vm296_vm3, %v247_v20, %v279_v44  ;;  %v474_v44 = vld [vmem:[%s1685_s7 + $0x38] sm:$0xff] }
 0x3fb   :  { %v316_v49 = vmul.f32 %v300_v4, %v1382_v50 }
 0x3fd   :  { %v251_v51 = vpop.permute.xlu0 %250  ;;  %v324_v57 = vadd.f32 %v316_v49, %v308_v28 }
 0x3ff   :  { %v253_v55 = vpop.permute.xlu1 %252  ;;  %941 = vmatpush3.bf16.xpose.msra.mxu1 %v497_v9  ;;  %v462_v10 = vpack.c.bf16 %v324_v57, %v323_v61 }
 0x401   :  { %v283_v60 = vpop.permute.xlu0 %282 }
 0x402   :  { %v302_v63 = vsel %vm296_vm3, %v251_v51, %v283_v60 }
 0x403   :  { %v318_v6 = vmul.f32 %v302_v63, %v1382_v50  ;;  %v285_v7 = vpop.permute.xlu1 %284 }
 0x404   :  { %v303_v15 = vsel %vm296_vm3, %v253_v55, %v285_v7 }
 0x405   :  { %v326_v14 = vadd.f32 %v318_v6, %v310_v3  ;;  %v255_v52 = vpop.permute.xlu0 %254  ;;  %v319_v35 = vmul.f32 %v303_v15, %v1378_v45  ;;  %v467_v45 = vld [vmem:[%s1685_s7] sm:$0xff]  ;;  %s1157_s7 = smov 32  }
 0x406   :  { %943 = vmatmul.mubr.msk.bf16.vlgmr.msra.gmra.mrb[0].mxu1 %vm152_vm2, %v462_v10 }
 0x407   :  { %v463_v17 = vpack.c.bf16 %v326_v14, %v325_v13  ;;  %v327_v8 = vadd.f32 %v319_v35, %v311_v12 }
 0x409   :  { %946 = vmatprep.mubr.msk.bf16.mxu1 %vm152_vm2, %v463_v17  ;;  %v287_v48 = vpop.permute.xlu0 %286 }
 0x40a   :  { %v304_v36 = vsel %vm296_vm3, %v255_v52, %v287_v48 }
 0x40b   :  { %v320_v58 = vmul.f32 %v304_v36, %v1382_v50 }
 0x40d   :  { %v328_v5 = vadd.f32 %v320_v58, %v312_v62 }
 0x40f   :  { %v464_v19 = vpack.c.bf16 %v328_v5, %v327_v8 }
 0x411   :  { %947 = vmatmul.mubr.msk.bf16.gmra.mrb[4].mxu1 %vm152_vm2, %v464_v19 }
 0x4d9   :  { %v944_v22 = vpop.f32.mrb[0].mxu1 }
 0x4da   :  { %v533_v24 = vpop.f32.mrb[1].mxu1  ;;  %v542_v34 = vadd.f32 %v944_v22, %v469_v2 }
 0x4db   :  { %v534_v50 = vadd.f32 %v533_v24, %v467_v45  ;;  %v945_v31 = vpop.f32.mrb[2].mxu1 }
 0x4dc   :  { %v536_v26 = vpop.f32.mrb[3].mxu1  ;;  %v545_v29 = vadd.f32 %v945_v31, %v470_v43  ;;  %v571_v40 = vsel %vm564_vm4, %v542_v34, -inf }
 0x4dd   :  { %v537_v32 = vadd.f32 %v536_v26, %v468_v37  ;;  %v565_v33 = vsel %vm564_vm4, %v534_v50, -inf }
 0x4de   :  { %566 = vmax.xlane.f32.xlu1 %v565_v33  ;;  %v574_v39 = vsel %vm564_vm4, %v545_v29, -inf }
 0x4df   :  { %v568_v38 = vsel %vm564_vm4, %v537_v32, -inf }
 0x4e0   :  { %569 = vmax.xlane.f32.xlu0 %v568_v38 }
 0x4e2   :  { %575 = vmax.xlane.f32.xlu1 %v574_v39  ;;  %v694_v39 = vpack.c.bf16 %v1300_v25, %v1295_v23 }
 0x4e4   :  { %572 = vmax.xlane.f32.xlu0 %v571_v40  ;;  %v948_v27 = vpop.f32.mrb[4].mxu1 }
 0x4e5   :  { %v549_v20 = vpop.f32.mrb[5].mxu1  ;;  %v558_v30 = vadd.f32 %v948_v27, %v473_v42 }
 0x4e6   :  { %v550_v47 = vadd.f32 %v549_v20, %v471_v41  ;;  %v949_v9 = vpop.f32.mrb[6].mxu1 }
 0x4e7   :  { %v552_v4 = vpop.f32.mrb[7].mxu1  ;;  %v561_v51 = vadd.f32 %v949_v9, %v474_v44  ;;  %v583_v54 = vsel %vm564_vm4, %v558_v30, -inf }
 0x4e8   :  { %v553_v11 = vadd.f32 %v552_v4, %v472_v46  ;;  %v577_v49 = vsel %vm564_vm4, %v550_v47, -inf }
 0x4e9   :  { %578 = vmax.xlane.f32.xlu0 %v577_v49  ;;  %v586_v28 = vsel %vm564_vm4, %v561_v51, -inf }
 0x4ea   :  { %v580_v53 = vsel %vm564_vm4, %v553_v11, -inf }
 0x4eb   :  { %581 = vmax.xlane.f32.xlu1 %v580_v53 }
 0x4ed   :  { %584 = vmax.xlane.f32.xlu0 %v583_v54 }
 0x4ef   :  { %587 = vmax.xlane.f32.xlu1 %v586_v28 }
 0x56b   :  { %v567_v55 = vpop.xlane.xlu1 %566 }
 0x56c   :  { %v589_v60 = vsub.f32 %v534_v50, %v567_v55 }
 0x56d   :  { %v570_v56 = vpop.xlane.xlu0 %569 }
 0x56e   :  { %v590_v57 = vsub.f32 %v537_v32, %v570_v56  ;;  %v597_v7 = vmul.f32 1.442695, %v589_v60 }
 0x56f   :  { %v576_v59 = vpop.xlane.xlu1 %575 }
 0x570   :  { %v592_v61 = vsub.f32 %v545_v29, %v576_v59  ;;  %v599_v63 = vmul.f32 1.442695, %v590_v57 }
 0x571   :  { %v573_v0 = vpop.xlane.xlu0 %572 }
 0x572   :  { %v603_v3 = vmul.f32 1.442695, %v592_v61  ;;  %v591_v6 = vsub.f32 %v542_v34, %v573_v0 }
 0x574   :  { %1040 = vpow2.f32 %v603_v3  ;;  %v601_v10 = vmul.f32 1.442695, %v591_v6  ;;  %v812_v3 = vld [vmem:[%s1680_s2] sm:$0xff]  ;;  %v813_v6 = vld [vmem:[%s1680_s2 + $0x8] sm:$0xff] }
 0x575   :  { %1042 = vpow2.f32 %v599_v63 }
 0x576   :  { %1044 = vpow2.f32 %v601_v10  ;;  %v579_v13 = vpop.xlane.xlu0 %578  ;;  %v814_v10 = vld [vmem:[%s1680_s2 + $0x10] sm:$0xff] }
 0x577   :  { %1046 = vpow2.f32 %v597_v7  ;;  %v593_v14 = vsub.f32 %v550_v47, %v579_v13  ;;  %v820_v7 = vpack.c.bf16 %v813_v6, %v812_v3  ;;  %v815_v13 = vld [vmem:[%s1680_s2 + $0x18] sm:$0xff] }
 0x578   :  { %v582_v52 = vpop.xlane.xlu1 %581 }
 0x579   :  { %v594_v17 = vsub.f32 %v553_v11, %v582_v52  ;;  %v605_v48 = vmul.f32 1.442695, %v593_v14  ;;  %v821_v14 = vpack.c.bf16 %v815_v13, %v814_v10  ;;  %v816_v52 = vld [vmem:[%s1680_s2 + $0x20] sm:$0xff] }
 0x57a   :  { %v585_v15 = vpop.xlane.xlu0 %584 }
 0x57b   :  { %v595_v35 = vsub.f32 %v558_v30, %v585_v15  ;;  %v607_v5 = vmul.f32 1.442695, %v594_v17  ;;  %v817_v15 = vld [vmem:[%s1680_s2 + $0x28] sm:$0xff] }
 0x57c   :  { %v588_v36 = vpop.xlane.xlu1 %587  ;;  %v822_v17 = vpack.c.bf16 %v817_v15, %v816_v52 }
 0x57d   :  { %v609_v12 = vmul.f32 1.442695, %v595_v35  ;;  %v596_v62 = vsub.f32 %v561_v51, %v588_v36  ;;  %v818_v36 = vld [vmem:[%s1680_s2 + $0x30] sm:$0xff] }
 0x57e   :  { %v1553_v58 = vpop.eup %1040 }
 0x57f   :  { %v1043_v8 = vpop.eup %1042  ;;  %1048 = vpow2.f32 %v609_v12  ;;  %v611_v19 = vmul.f32 1.442695, %v596_v62  ;;  %v622_v45 = vsel %vm564_vm4, %v1553_v58, 0.0  ;;  %v819_v12 = vld [vmem:[%s1680_s2 + $0x38] sm:$0xff]  ;;  %s1160_s2 = smov 104  }
 0x580   :  { %v1557_v22 = vpop.eup %1044  ;;  %1050 = vpow2.f32 %v605_v48  ;;  %623 = vadd.xlane.f32.xlu1 %v622_v45  ;;  %v616_v37 = vsel %vm564_vm4, %v1043_v8, 0.0 }
 0x581   :  { %1052 = vpow2.f32 %v611_v19  ;;  %v619_v24 = vsel %vm564_vm4, %v1557_v22, 0.0  ;;  %v1047_v43 = vpop.eup %1046 }
 0x582   :  { %620 = vadd.xlane.f32.xlu0 %v619_v24  ;;  %1054 = vpow2.f32 %v607_v5  ;;  %v613_v50 = vsel %vm564_vm4, %v1047_v43, 0.0 }
 0x584   :  { %617 = vadd.xlane.f32.xlu1 %v616_v37 }
 0x586   :  { %614 = vadd.xlane.f32.xlu0 %v613_v50 }
 0x589   :  { %v1563_v31 = vpop.eup %1048 }
 0x58a   :  { %v1051_v2 = vpop.eup %1050  ;;  %v631_v26 = vsel %vm564_vm4, %v1563_v31, 0.0 }
 0x58b   :  { %v1053_v29 = vpop.eup %1052  ;;  %632 = vadd.xlane.f32.xlu0 %v631_v26  ;;  %v625_v34 = vsel %vm564_vm4, %v1051_v2, 0.0 }
 0x58c   :  { %v634_v32 = vsel %vm564_vm4, %v1053_v29, 0.0  ;;  %v1055_v33 = vpop.eup %1054 }
 0x58d   :  { %635 = vadd.xlane.f32.xlu1 %v634_v32  ;;  %v628_v38 = vsel %vm564_vm4, %v1055_v33, 0.0 }
 0x58f   :  { %626 = vadd.xlane.f32.xlu0 %v625_v34 }
 0x591   :  { %629 = vadd.xlane.f32.xlu1 %v628_v38 }
 0x5a2   :  { %699 = vrot.lane.b32.xlu1 %v694_v39, %s1157_s7 }
 0x5a5   :  { %697 = vrot.lane.b32.xlu0 %v693_v21, %s1157_s7 }
 0x60d   :  { %v624_v40 = vpop.xlane.xlu1 %623 }
 0x60f   :  { %v621_v41 = vpop.xlane.xlu0 %620 }
 0x611   :  { %v618_v27 = vpop.xlane.xlu1 %617 }
 0x612   :  { %1056 = vrcp.f32 %v618_v27 }
 0x613   :  { %v615_v42 = vpop.xlane.xlu0 %614 }
 0x614   :  { %1058 = vrcp.f32 %v615_v42 }
 0x615   :  { %1060 = vrcp.f32 %v621_v41 }
 0x618   :  { %v633_v20 = vpop.xlane.xlu0 %632 }
 0x61a   :  { %v636_v46 = vpop.xlane.xlu1 %635 }
 0x61c   :  { %v1057_v47 = vpop.eup %1056  ;;  %v627_v9 = vpop.xlane.xlu0 %626 }
 0x61d   :  { %v1577_v4 = vmul.f32 %v1057_v47, %v1043_v8 }
 0x61e   :  { %v1059_v44 = vpop.eup %1058  ;;  %v630_v23 = vpop.xlane.xlu1 %629 }
 0x61f   :  { %1062 = vrcp.f32 %v630_v23  ;;  %v645_v25 = vmul.f32 %v1059_v44, %v1047_v43  ;;  %v1061_v30 = vpop.eup %1060 }
 0x620   :  { %1064 = vrcp.f32 %v624_v40  ;;  %v698_v16 = vpop.permute.xlu0 %697  ;;  %v647_v53 = vmul.f32 %v1061_v30, %v1557_v22 }
 0x621   :  { %1066 = vrcp.f32 %v627_v9  ;;  %950 = vmatprep.subr.bf16.mxu0 %v698_v16  ;;  %681 = vst.msk [vmem:[%s1687_s9] sm:$0xff] %vm296_vm3, %v645_v25  ;;  %v689_v18 = vpack.c.bf16 %v1577_v4, %v645_v25 }
 0x622   :  { %951 = vmatpush3.bf16.msra.mxu0 %v698_v16  ;;  %1068 = vrcp.f32 %v636_v46  ;;  %v700_v21 = vpop.permute.xlu1 %699 }
 0x623   :  { %952 = vmatprep.subr.bf16.mxu0 %v698_v16  ;;  %958 = vmatprep.mubr.msk.bf16.mxu0 %vm564_vm4, %v689_v18  ;;  %1070 = vrcp.f32 %v633_v20 }
 0x626   :  { %953 = vmatpush3.bf16.msra.mxu0 %v698_v16 }
 0x627   :  { %954 = vmatprep.subr.bf16.mxu0 %v700_v21 }
 0x629   :  { %v1063_v11 = vpop.eup %1062 }
 0x62a   :  { %v1065_v49 = vpop.eup %1064  ;;  %955 = vmatpush3.bf16.msra.mxu0 %v700_v21  ;;  %v650_v54 = vmul.f32 %v1063_v11, %v1055_v33 }
 0x62b   :  { %v1067_v51 = vpop.eup %1066  ;;  %956 = vmatprep.subr.bf16.mxu0 %v700_v21  ;;  %v648_v28 = vmul.f32 %v1065_v49, %v1553_v58  ;;  %v823_v58 = vpack.c.bf16 %v819_v12, %v818_v36 }
 0x62c   :  { %v649_v55 = vmul.f32 %v1067_v51, %v1051_v2  ;;  %v1069_v57 = vpop.eup %1068 }
 0x62d   :  { %v690_v56 = vpack.c.bf16 %v648_v28, %v647_v53  ;;  %v1071_v60 = vpop.eup %1070  ;;  %v652_v61 = vmul.f32 %v1069_v57, %v1053_v29 }
 0x62e   :  { %957 = vmatpush3.bf16.msra.mxu0 %v700_v21  ;;  %v691_v59 = vpack.c.bf16 %v650_v54, %v649_v55  ;;  %v651_v63 = vmul.f32 %v1071_v60, %v1563_v31 }
 0x62f   :  { %966 = vmatprep.subr.bf16.mxu0 %v1148_v1 }
 0x630   :  { %v692_v0 = vpack.c.bf16 %v652_v61, %v651_v63 }
 0x631   :  { %959 = vmatmul.mubr.msk.bf16.vlgmr.msra.gmra.mrb[4].mxu0 %vm564_vm4, %v690_v56 }
 0x632   :  { %962 = vmatprep.mubr.msk.bf16.mxu0 %vm564_vm4, %v691_v59  ;;  %967 = vmatpush3.bf16.msra.mxu0 %v820_v7 }
 0x633   :  { %968 = vmatprep.subr.bf16.mxu0 %v1148_v1 }
 0x636   :  { %969 = vmatpush3.bf16.msra.mxu0 %v821_v14 }
 0x637   :  { %970 = vmatprep.subr.bf16.mxu0 %v1148_v1 }
 0x639   :  { %963 = vmatmul.mubr.msk.bf16.gmra.mrb[8].mxu0 %vm564_vm4, %v692_v0 }
 0x63a   :  { %974 = vmatprep.mubr.msk.bf16.mxu0 %vm1149_vm0, %v1148_v1  ;;  %971 = vmatpush3.bf16.msra.mxu0 %v822_v17 }
 0x63b   :  { %972 = vmatprep.subr.bf16.mxu0 %v1148_v1 }
 0x63e   :  { %973 = vmatpush3.bf16.msra.mxu0 %v823_v58 }
 0x704   :  { %v960_v35 = vpop.f32.mrb[4].mxu0 }
 0x705   :  { %v749_v48 = vpop.f32.mrb[5].mxu0 }
 0x706   :  { %v961_v62 = vpop.f32.mrb[6].mxu0 }
 0x707   :  { %v1001_v8 = vpack.i.bf16 %v961_v62, %v960_v35  ;;  %v752_v5 = vpop.f32.mrb[7].mxu0 }
 0x709   :  { %1002 = vrot.lane.b32.xlu1 %v1001_v8, %s1158_s26 }
 0x70c   :  { %v964_v19 = vpop.f32.mrb[8].mxu0 }
 0x70d   :  { %v765_v45 = vpop.f32.mrb[9].mxu0 }
 0x70e   :  { %v965_v22 = vpop.f32.mrb[10].mxu0 }
 0x70f   :  { %v1011_v24 = vpack.i.bf16 %v965_v22, %v964_v19  ;;  %v768_v1 = vpop.f32.mrb[11].mxu0 }
 0x710   :  { %v1006_v43 = vpack.i.bf16 %v768_v1, %v765_v45 }
 0x711   :  { %1012 = vrot.lane.b32.xlu1 %v1011_v24, %s1159_s27 }
 0x712   :  { %1007 = vrot.lane.b32.xlu0 %v1006_v43, %s1157_s7 }
 0x715   :  { %658 = vrot.lane.b32.xlu1 %v647_v53, %s1152_s0 }
 0x716   :  { %654 = vrot.lane.b32.xlu0 %v1577_v4, %s1156_s3 }
 0x719   :  { %666 = vrot.lane.b32.xlu1 %v649_v55, %s1151_s4 }
 0x71a   :  { %662 = vrot.lane.b32.xlu0 %v648_v28, %s1160_s2 }
 0x71d   :  { %674 = vrot.lane.b32.xlu1 %v651_v63, %s1153_s28 }
 0x71e   :  { %670 = vrot.lane.b32.xlu0 %v650_v54, %s1161_s1 }
 0x722   :  { %678 = vrot.lane.b32.xlu0 %v652_v61, %s1154_s29 }
 0x77b   :  { %v1003_v37 = vpop.permute.xlu1 %1002 }
 0x77c   :  { %v1005_v50 = vunpack.i.h.bf16 %v1003_v37  ;;  %v1004_v31 = vunpack.i.l.bf16 %v1003_v37 }
 0x77e   :  { %v804_v33 = vsel %vm152_vm2, %v749_v48, %v1004_v31  ;;  %v805_v34 = vsel %vm152_vm2, %v752_v5, %v1005_v50 }
 0x783   :  { %v1013_v2 = vpop.permute.xlu1 %1012 }
 0x784   :  { %v1008_v26 = vpop.permute.xlu0 %1007  ;;  %v1015_v38 = vunpack.i.h.bf16 %v1013_v2  ;;  %v1014_v39 = vunpack.i.l.bf16 %v1013_v2 }
 0x785   :  { %v1010_v29 = vunpack.i.h.bf16 %v1008_v26  ;;  %v1009_v32 = vunpack.i.l.bf16 %v1008_v26 }
 0x787   :  { %v807_v40 = vsel %vm70_vm1, %v805_v34, %v1010_v29  ;;  %v806_v41 = vsel %vm70_vm1, %v804_v33, %v1009_v32  ;;  %v659_v27 = vpop.permute.xlu1 %658 }
 0x788   :  { %v810_v42 = vsel %vm808_vm5, %v807_v40, %v1015_v38  ;;  %v809_v20 = vsel %vm808_vm5, %v806_v41, %v1014_v39  ;;  %683 = vst.msk [vmem:[%s1687_s9 + $0x10] sm:$0xff] %vm296_vm3, %v659_v27  ;;  %v655_v46 = vpop.permute.xlu0 %654 }
 0x789   :  { %v811_v47 = vpack.c.bf16 %v810_v42, %v809_v20  ;;  %682 = vst.msk [vmem:[%s1687_s9 + $0x8] sm:$0xff] %vm296_vm3, %v655_v46 }
 0x78b   :  { %v667_v9 = vpop.permute.xlu1 %666  ;;  %975 = vmatmul.mubr.msk.bf16.vlgmr.msra.gmra.mrb[12].mxu0 %vm564_vm4, %v811_v47 }
 0x78c   :  { %685 = vst.msk [vmem:[%s1687_s9 + $0x20] sm:$0xff] %vm296_vm3, %v667_v9  ;;  %v663_v44 = vpop.permute.xlu0 %662 }
 0x78d   :  { %684 = vst.msk [vmem:[%s1687_s9 + $0x18] sm:$0xff] %vm296_vm3, %v663_v44 }
 0x78f   :  { %v675_v23 = vpop.permute.xlu1 %674 }
 0x790   :  { %687 = vst.msk [vmem:[%s1687_s9 + $0x30] sm:$0xff] %vm296_vm3, %v675_v23  ;;  %v671_v25 = vpop.permute.xlu0 %670 }
 0x791   :  { %686 = vst.msk [vmem:[%s1687_s9 + $0x28] sm:$0xff] %vm296_vm3, %v671_v25 }
 0x794   :  { %v679_v4 = vpop.permute.xlu0 %678 }
 0x795   :  { %688 = vst.msk [vmem:[%s1687_s9 + $0x38] sm:$0xff] %vm296_vm3, %v679_v4 }
 0x85e   :  { %v861_v16 = vpop.f32.mrb[12].mxu0 }
 0x85f   :  { %868 = vst.msk [vmem:[#allocation7] sm:$0xff] %vm70_vm1, %v861_v16  ;;  %v976_v18 = vpop.f32.mrb[13].mxu0 }
 0x860   :  { %v864_v21 = vpop.f32.mrb[14].mxu0 }
 0x861   :  { %869 = vst.msk [vmem:[#allocation7 + $0x8] sm:$0xff] %vm70_vm1, %v864_v21  ;;  %v977_v30 = vpop.f32.mrb[15].mxu0 }
 0x862   :  { %1127 = shalt.err (!%p1124_p6)
}
 0x863   :  { %s1128_s21 = scalar_lea.hbm %s1686_s8, 256 }
 0x864   :  { %p1129_p7 = scmp.ne.s32.totalorder %s1686_s8, %s1128_s21  ;;  %p1132_p8 = scmp.lt.u32.totalorder %s1128_s21, %s1686_s8 }
 0x866   :  { %p1134_p9 = pnand %p1132_p8, %p1129_p7 }
 0x868   :  { %1137 = shalt.err (!%p1134_p9)
}
 0x869   :  { %881 = dma.vmem_to_hbm [thread:$0]  %s876_s16, 256, %s1686_s8, [#allocation4], %s1145_s19, %s1145_s19, %s1146_s20  }
 0x86a   :  { %1142 = dma.done.wait [#allocation4], 256  }
 0x86b   :  { %1143 = vsyncadd [#allocation4], 4294967040 }
 0x86c   :  { %889 = vsyncpa [#allocation3], 1 }
 0x86d   :  { %890 = vsyncpa [#allocation6], 1 }
 0x86e   :  { %891 = vsyncpa [#allocation4], 1 }

</bundles_post_ra>
